<compile_context>
chip_gen: v6e
topology: v6e:2x2x1
jax: 0.10.0
libtpu: 0.0.40
codegen_flags: <defaults>
</compile_context>

<pallas_src>
import jax
import jax.numpy as jnp
from jax.experimental import pallas as pl
from jax.experimental.pallas import tpu as pltpu


def _round_up(x, m):
    return ((x + m - 1) // m) * m


def _choose_tile(n_pad, max_tile_n):
    """Largest lane tile <= max_tile_n, but keep >=2 grid steps when splittable
    (so the 'parallel' grid axis can shard across v7x's two TensorCores)."""
    tile = min(max_tile_n, n_pad)
    if n_pad > 128 and pl.cdiv(n_pad, tile) < 2:
        tile = _round_up(pl.cdiv(n_pad, 2), 128)
    return tile


# ---------------------------------------------------------------------------
# Kernel
# ---------------------------------------------------------------------------
def _iv_kernel(z_ref, p_ref, out_ref):
    # z_ref : (3, TILE_N) lane-dense batch tile (streamed)
    # p_ref : (8, 128)    packed params (resident: constant index_map)
    # out   : (2, TILE_N) row 0 = mean, row 1 = exp(logscale)
    z = z_ref[...]
    P = p_ref[...]

    w1 = P[0:6, 0:3]          # (6, 3)
    w2 = P[0:6, 8:14]         # (6, 6)
    wh = P[0:2, 16:22]        # (2, 6)  fused [mean; logscale] head weights
    b1 = P[0:6, 120:121]      # (6, 1)
    b2 = P[0:6, 121:122]      # (6, 1)
    bh = P[0:2, 122:123]      # (2, 1)

    hp = jax.lax.Precision.HIGHEST  # exact f32 accumulation on the MXU

    # Linear(3, 6) + ReLU  ->  (6, TILE_N)
    h = jnp.dot(w1, z, preferred_element_type=jnp.float32, precision=hp) + b1
    h = jnp.maximum(h, 0.0)

    # Linear(6, 6) + ReLU  ->  (6, TILE_N)
    h = jnp.dot(w2, h, preferred_element_type=jnp.float32, precision=hp) + b2
    h = jnp.maximum(h, 0.0)

    # Fused heads: one (2, 6) @ (6, TILE_N) matmul.
    out = jnp.dot(wh, h, preferred_element_type=jnp.float32, precision=hp) + bh

    # exp only on the scale row (EUP), plain store for the mean row.
    out_ref[0:1, :] = out[0:1, :]
    out_ref[1:2, :] = jnp.exp(out[1:2, :])


# ---------------------------------------------------------------------------
# Host-side helpers / wrapper
# ---------------------------------------------------------------------------
def pack_params(params):
    """Pack all weights/biases into a single (8, 128) f32 VMEM-resident slab."""
    w1, b1, w2, b2, wm, bm, ws, bs = params
    wh = jnp.concatenate([wm, ws], axis=0)        # (2, 6)
    bh = jnp.concatenate([bm, bs], axis=0)        # (2,)
    P = jnp.zeros((8, 128), jnp.float32)
    P = P.at[0:6, 0:3].set(w1.astype(jnp.float32))
    P = P.at[0:6, 8:14].set(w2.astype(jnp.float32))
    P = P.at[0:2, 16:22].set(wh.astype(jnp.float32))
    P = P.at[0:6, 120].set(b1.astype(jnp.float32))
    P = P.at[0:6, 121].set(b2.astype(jnp.float32))
    P = P.at[0:2, 122].set(bh.astype(jnp.float32))
    return P


def iv_model_forward_packed(idx, Z_table, params, *, max_tile_n=32768):
    """Fused gather + MLP. Returns the lane-dense (2, n_pad) output slab
    (row 0 = mean, row 1 = scale); columns >= len(idx) are padding."""
    N = idx.shape[0]
    n_pad = _round_up(max(N, 1), 128)
    tile_n = _choose_tile(n_pad, max_tile_n)

    # data.Z[idx], produced directly in the lane-dense (3, n_pad) layout:
    # pad the cheap int32 index vector, then take columns of the transposed
    # table.  No separate transpose or pad pass over the gathered f32 data.
    idx_p = jnp.pad(idx.astype(jnp.int32), (0, n_pad - N))
    z_t = Z_table.astype(jnp.float32).T[:, idx_p]          # (3, n_pad)

    p_slab = pack_params(params)

    grid = (pl.cdiv(n_pad, tile_n),)
    out = pl.pallas_call(
        _iv_kernel,
        out_shape=jax.ShapeDtypeStruct((2, n_pad), jnp.float32),
        grid=grid,
        in_specs=[
            # streamed lane-dense batch tile
            pl.BlockSpec((3, tile_n), lambda i: (0, i)),
            # grid-invariant packed params (constant block index -> resident)
            pl.BlockSpec((8, 128), lambda i: (0, 0)),
        ],
        out_specs=pl.BlockSpec((2, tile_n), lambda i: (0, i)),
        compiler_params=pltpu.CompilerParams(
            dimension_semantics=("parallel",)),
    )(z_t, p_slab)
    return out


def iv_model_forward(idx, Z_table, params, *, max_tile_n=32768):
    """Mirrors IVModel.forward(idx). Returns (mean, scale), each (N, 1) f32.

    Note: the final slice/reshape is an extra pass over the output; consumers
    that can use the packed layout should call iv_model_forward_packed."""
    N = idx.shape[0]
    out = iv_model_forward_packed(idx, Z_table, params, max_tile_n=max_tile_n)
    mean = out[0, :N].reshape(N, 1)
    scale = out[1, :N].reshape(N, 1)
    return mean, scale


# ---------------------------------------------------------------------------
# Init / reference
# ---------------------------------------------------------------------------
def init_params(key):
    """PyTorch nn.Linear-style init; weights (out, in), biases (out,)."""
    def linear(k, fan_in, fan_out):
        kw, kb = jax.random.split(k)
        bound = 1.0 / jnp.sqrt(fan_in)
        w = jax.random.uniform(kw, (fan_out, fan_in), jnp.float32, -bound, bound)
        b = jax.random.uniform(kb, (fan_out,), jnp.float32, -bound, bound)
        return w, b

    k1, k2, k3, k4 = jax.random.split(key, 4)
    w1, b1 = linear(k1, 3, 6)
    w2, b2 = linear(k2, 6, 6)
    wm, bm = linear(k3, 6, 1)
    ws, bs = linear(k4, 6, 1)
    return (w1, b1, w2, b2, wm, bm, ws, bs)


def reference_forward(z, params):
    """Pure-JAX reference in batch-major layout (matches PyTorch x @ W.T + b)."""
    w1, b1, w2, b2, wm, bm, ws, bs = params
    z = z.astype(jnp.float32)
    h = jnp.maximum(z @ w1.T + b1, 0.0)
    h = jnp.maximum(h @ w2.T + b2, 0.0)
    mean = h @ wm.T + bm
    scale = jnp.exp(h @ ws.T + bs)
    return mean, scale


if __name__ == "__main__":
    key = jax.random.PRNGKey(0)
    k_params, k_data, k_idx = jax.random.split(key, 3)

    # Synthetic data.Z table and a small index batch.
    Z_table = jax.random.normal(k_data, (100, 3), jnp.float32)   # data.Z
    idx = jax.random.randint(k_idx, (32,), 0, 100)               # batch of indices
    params = init_params(k_params)

    fwd = jax.jit(lambda i: iv_model_forward(i, Z_table, params))
    mean, scale = jax.block_until_ready(fwd(idx))

    # Sanity check against the pure-JAX reference (f32; PyTorch ref is f64).
    ref_mean, ref_scale = reference_forward(Z_table[idx], params)
    assert mean.shape == (32, 1) and scale.shape == (32, 1)
    assert jnp.allclose(mean, ref_mean, atol=1e-5, rtol=1e-5)
    assert jnp.allclose(scale, ref_scale, atol=1e-5, rtol=1e-5)

    print("KERNEL_OK")
</pallas_src>

<mosaic_0001>
module attributes {stable_mosaic.version = 11 : i64} {
  func.func @_iv_kernel(%arg0: i32, %arg1: memref<3x128xf32, #tpu.memory_space<vmem>>, %arg2: memref<8x128xf32, #tpu.memory_space<vmem>>, %arg3: memref<2x128xf32, #tpu.memory_space<vmem>>) attributes {dimension_semantics = [#tpu.dimension_semantics<parallel>], iteration_bounds = array<i64: 1>, scalar_prefetch = 0 : i64, scratch_operands = 0 : i64, tpu.core_type = #tpu.core_type<tc>, window_params = [{transform_indices = @transform_0, window_bounds = array<i64: 3, 128>}, {pipeline_mode = #tpu.pipeline_mode<synchronous>, transform_indices = @transform_1, window_bounds = array<i64: 8, 128>}, {transform_indices = @transform_2, window_bounds = array<i64: 2, 128>}]} {
    %c0 = arith.constant 0 : index
    %c0_0 = arith.constant 0 : index
    %0 = vector.load %arg1[%c0, %c0_0] : memref<3x128xf32, #tpu.memory_space<vmem>>, vector<3x128xf32>
    %c0_1 = arith.constant 0 : index
    %c0_2 = arith.constant 0 : index
    %1 = vector.load %arg2[%c0_1, %c0_2] : memref<8x128xf32, #tpu.memory_space<vmem>>, vector<8x128xf32>
    %2 = vector.extract_strided_slice %1 {offsets = [0, 0], sizes = [6, 3], strides = [1, 1]} : vector<8x128xf32> to vector<6x3xf32>
    %3 = vector.extract_strided_slice %1 {offsets = [0, 8], sizes = [6, 6], strides = [1, 1]} : vector<8x128xf32> to vector<6x6xf32>
    %4 = vector.extract_strided_slice %1 {offsets = [0, 16], sizes = [2, 6], strides = [1, 1]} : vector<8x128xf32> to vector<2x6xf32>
    %5 = vector.extract_strided_slice %1 {offsets = [0, 120], sizes = [6, 1], strides = [1, 1]} : vector<8x128xf32> to vector<6x1xf32>
    %6 = vector.extract_strided_slice %1 {offsets = [0, 121], sizes = [6, 1], strides = [1, 1]} : vector<8x128xf32> to vector<6x1xf32>
    %7 = vector.extract_strided_slice %1 {offsets = [0, 122], sizes = [2, 1], strides = [1, 1]} : vector<8x128xf32> to vector<2x1xf32>
    %cst = arith.constant dense<0.000000e+00> : vector<6x128xf32>
    %8 = tpu.matmul %2, %0, %cst {dimension_numbers = #tpu.dot_dimension_numbers<[1], [0], [0], [1], [0, 0, 1, 1], [], []>, precision = #tpu.contract_precision<fp32>} : vector<6x3xf32>, vector<3x128xf32>, vector<6x128xf32> -> vector<6x128xf32>
    %9 = vector.broadcast %5 : vector<6x1xf32> to vector<6x128xf32>
    %10 = arith.addf %8, %9 : vector<6x128xf32>
    %cst_3 = arith.constant 0.000000e+00 : f32
    %11 = vector.broadcast %cst_3 : f32 to vector<6x128xf32>
    %12 = arith.maximumf %10, %11 : vector<6x128xf32>
    %cst_4 = arith.constant dense<0.000000e+00> : vector<6x128xf32>
    %13 = tpu.matmul %3, %12, %cst_4 {dimension_numbers = #tpu.dot_dimension_numbers<[1], [0], [0], [1], [0, 0, 1, 1], [], []>, precision = #tpu.contract_precision<fp32>} : vector<6x6xf32>, vector<6x128xf32>, vector<6x128xf32> -> vector<6x128xf32>
    %14 = vector.broadcast %6 : vector<6x1xf32> to vector<6x128xf32>
    %15 = arith.addf %13, %14 : vector<6x128xf32>
    %cst_5 = arith.constant 0.000000e+00 : f32
    %16 = vector.broadcast %cst_5 : f32 to vector<6x128xf32>
    %17 = arith.maximumf %15, %16 : vector<6x128xf32>
    %cst_6 = arith.constant dense<0.000000e+00> : vector<2x128xf32>
    %18 = tpu.matmul %4, %17, %cst_6 {dimension_numbers = #tpu.dot_dimension_numbers<[1], [0], [0], [1], [0, 0, 1, 1], [], []>, precision = #tpu.contract_precision<fp32>} : vector<2x6xf32>, vector<6x128xf32>, vector<2x128xf32> -> vector<2x128xf32>
    %19 = vector.broadcast %7 : vector<2x1xf32> to vector<2x128xf32>
    %20 = arith.addf %18, %19 : vector<2x128xf32>
    %21 = vector.extract_strided_slice %20 {offsets = [0, 0], sizes = [1, 128], strides = [1, 1]} : vector<2x128xf32> to vector<1x128xf32>
    %c0_7 = arith.constant 0 : index
    %c0_8 = arith.constant 0 : index
    %22 = vector.load %arg3[%c0_7, %c0_8] : memref<2x128xf32, #tpu.memory_space<vmem>>, vector<1x128xf32>
    tpu.vector_store %arg3[%c0_7, %c0_8], %21 {strides = array<i32>} : memref<2x128xf32, #tpu.memory_space<vmem>>, vector<1x128xf32>,
    %23 = vector.extract_strided_slice %20 {offsets = [1, 0], sizes = [1, 128], strides = [1, 1]} : vector<2x128xf32> to vector<1x128xf32>
    %24 = math.exp %23 : vector<1x128xf32>
    %c1 = arith.constant 1 : index
    %c0_9 = arith.constant 0 : index
    %25 = vector.load %arg3[%c1, %c0_9] : memref<2x128xf32, #tpu.memory_space<vmem>>, vector<1x128xf32>
    tpu.vector_store %arg3[%c1, %c0_9], %24 {strides = array<i32>} : memref<2x128xf32, #tpu.memory_space<vmem>>, vector<1x128xf32>,
    return
  }
  func.func @transform_0(%arg0: i32) -> (i32, i32) {
    %c0_i32 = arith.constant 0 : i32
    %c0_i32_0 = arith.constant 0 : i32
    return %c0_i32, %arg0 : i32, i32
  }
  func.func @transform_1(%arg0: i32) -> (i32, i32) {
    %c0_i32 = arith.constant 0 : i32
    %c0_i32_0 = arith.constant 0 : i32
    %c0_i32_1 = arith.constant 0 : i32
    return %c0_i32, %c0_i32_0 : i32, i32
  }
  func.func @transform_2(%arg0: i32) -> (i32, i32) {
    %c0_i32 = arith.constant 0 : i32
    %c0_i32_0 = arith.constant 0 : i32
    return %c0_i32, %arg0 : i32, i32
  }
}

</mosaic_0001>

<bundles_post_ra>
// kernel: _lambda_.1
= control target key start
LH: loop header
LB: loop body
LE: loop exit
PB: predicated region body
PF: predicated region fallthrough
CT: control target
= control target key end

     0   :  { %vm21_vm0 = vcmask 1042432   ;;  %vm18_vm1 = vcmask 23552   ;;  %v1535_v0 = vmov 0.0   ;;  %vm1536_vm2 = vmmov 0   ;;  %s1635_s0 = inlined_call_operand.vmem [shape: f32[3,128], index: 0, kind: input, shape index: {}]   ;;  %s1636_s1 = inlined_call_operand.vmem [shape: f32[8,128], index: 1, kind: input, shape index: {}]   ;;  %s1637_s2 = inlined_call_operand.vmem [shape: f32[2,128], index: 2, kind: output, shape index: {}]  }
   0x1   :  { %1433 = vmatprep.subr.mxu0 %v1535_v0  ;;  %v11_v1 = vld [vmem:[%s1635_s0] sm:$0x7]  ;;  %1435 = vmatprep.mubr.msk.f32.mxu0 %vm1536_vm2, %v1535_v0  ;;  %v1537_v7 = vmov 120   ;;  %s1538_s0 = smov 120   ;;  %v1539_v16 = vmov 121   ;;  %vm478_vm3 = vcmask 48128  }
   0x2   :  { %v1566_v2 = vld [vmem:[%s1636_s1] sm:$0xff]  ;;  %v23_v3 = vsel %vm21_vm0, %v11_v1, 0  ;;  %1438 = vmatprep.subr.mxu1 %v1535_v0  ;;  %1440 = vmatprep.mubr.msk.f32.mxu1 %vm1536_vm2, %v1535_v0  ;;  %s1540_s1 = smov 112   ;;  %vm481_vm4 = vcmask 1045504   ;;  %v1541_v50 = vmov 122  }
   0x3   :  { %v19_v4 = vsel %vm18_vm1, %v1566_v2, 0  ;;  %v56_v5 = vand.u32 4294901760, %v23_v3  ;;  %1530 = vset.pattern.permute.xlu0 %v1537_v7  ;;  %1531 = vset.pattern.permute.xlu1 %v1539_v16 }
   0x4   :  { %v91_v6 = vand.u32 4294901760, %v19_v4  ;;  %15 = vperm.xlu0 %1530, %v1566_v2   ;;  %473 = vperm.xlu1 %1531, %v1566_v2  }
   0x5   :  { %1434 = vmatpush3.msra.mxu0 %v56_v5  ;;  %v133_v9 = vsub.f32 %v23_v3, %v56_v5 }
   0x6   :  { %v92_v8 = vsub.f32 %v19_v4, %v91_v6  ;;  %1443 = vmatprep.subr.mxu0 %v1535_v0 }
   0x7   :  { %v134_v11 = vand.u32 4294901760, %v133_v9 }
   0x8   :  { %v93_v10 = vand.u32 4294901760, %v92_v8  ;;  %476 = vrot.lane.b32.xlu0 %v1566_v2, %s1538_s0  ;;  %936 = vrot.lane.b32.xlu1 %v1566_v2, %s1540_s1 }
   0x9   :  { %v135_v13 = vsub.f32 %v133_v9, %v134_v11  ;;  %1532 = vset.pattern.permute.xlu0 %v1541_v50 }
   0xa   :  { %v94_v12 = vsub.f32 %v92_v8, %v93_v10 }
   0xb   :  { %v136_v15 = vand.u32 4294901760, %v135_v13 }
   0xc   :  { %v95_v14 = vand.u32 4294901760, %v94_v12  ;;  %933 = vperm.xlu0 %1532, %v1566_v2  }
   0xd   :  { %1439 = vmatpush3.msra.mxu1 %v136_v15 }
   0xe   :  { %1436 = vmatmul.mubr.f32.vlgmr.msra.gmra.mxu0 %v95_v14  ;;  %1441 = vmatmul.mubr.f32.vlgmr.msra.gmra.mxu1 %v91_v6 }
   0xf   :  { %1444 = vmatpush3.msra.mxu0 %v133_v9  ;;  %1445 = vmatprep.mubr.msk.f32.mxu0 %vm1536_vm2, %v1535_v0 }
  0x10   :  { %1448 = vmatprep.subr.mxu1 %v1535_v0  ;;  %1450 = vmatprep.mubr.msk.f32.mxu1 %vm1536_vm2, %v1535_v0 }
  0x11   :  { %1449 = vmatpush3.msra.mxu1 %v56_v5  ;;  %1453 = vmatprep.subr.mxu0 %v1535_v0 }
  0x12   :  { %1446 = vmatmul.mubr.f32.vlgmr.msra.gmra.mxu0 %v92_v8  ;;  %1451 = vmatmul.mubr.f32.vlgmr.msra.gmra.mxu1 %v93_v10 }
  0x13   :  { %1454 = vmatpush3.msra.mxu0 %v134_v11  ;;  %1455 = vmatprep.mubr.msk.f32.mxu0 %vm1536_vm2, %v1535_v0 }
  0x14   :  { %1458 = vmatprep.subr.mxu1 %v1535_v0  ;;  %1460 = vmatprep.mubr.msk.f32.mxu1 %vm1536_vm2, %v1535_v0 }
  0x15   :  { %1459 = vmatpush3.msra.mxu1 %v56_v5  ;;  %1463 = vmatprep.subr.mxu0 %v1535_v0 }
  0x16   :  { %1456 = vmatmul.mubr.f32.vlgmr.msra.gmra.mxu0 %v91_v6  ;;  %1461 = vmatmul.mubr.f32.vlgmr.msra.gmra.mxu1 %v91_v6 }
  0x17   :  { %1465 = vmatprep.mubr.msk.f32.mxu0 %vm1536_vm2, %v1535_v0  ;;  %1468 = vmatprep.subr.mxu1 %v1535_v0 }
  0x18   :  { %1470 = vmatprep.mubr.msk.f32.mxu1 %vm1536_vm2, %v1535_v0 }
  0x7f   :  { %v16_v17 = vpop.permute.xlu0 %15  ;;  %v474_v51 = vpop.permute.xlu1 %473 }
  0x83   :  { %v477_v18 = vpop.permute.xlu0 %476  ;;  %v937_v52 = vpop.permute.xlu1 %936 }
  0x84   :  { %v479_v19 = vsel %vm478_vm3, %v477_v18, 0  ;;  %v938_v55 = vsel %vm478_vm3, %v937_v52, 0 }
  0x85   :  { %v551_v20 = vand.u32 4294901760, %v479_v19  ;;  %v1009_v57 = vand.u32 4294901760, %v938_v55 }
  0x87   :  { %v552_v27 = vsub.f32 %v479_v19, %v551_v20  ;;  %v1010_v63 = vsub.f32 %v938_v55, %v1009_v57 }
  0x89   :  { %v553_v33 = vand.u32 4294901760, %v552_v27  ;;  %v1011_v2 = vand.u32 4294901760, %v1010_v63 }
  0x8b   :  { %v554_v39 = vsub.f32 %v552_v27, %v553_v33  ;;  %v1012_v10 = vsub.f32 %v1010_v63, %v1011_v2 }
  0x8d   :  { %v555_v43 = vand.u32 4294901760, %v554_v39  ;;  %v1013_v14 = vand.u32 4294901760, %v1012_v10 }
  0xce   :  { %v97_v21 = vpop.f32.mrf.mxu0  ;;  %v173_v23 = vpop.f32.mrf.mxu1 }
  0xcf   :  { %v98_v22 = vadd.f32 %v97_v21, %v16_v17 }
  0xd0   :  { %v1437_v24 = vpop.f32.mrf.mxu0  ;;  %v1442_v26 = vpop.f32.mrf.mxu1 }
  0xd1   :  { %v174_v25 = vadd.f32 %v173_v23, %v98_v22  ;;  %v934_v24 = vpop.permute.xlu0 %933 }
  0xd2   :  { %v247_v28 = vpop.f32.mrf.mxu0  ;;  %v321_v30 = vpop.f32.mrf.mxu1 }
  0xd3   :  { %v248_v29 = vadd.f32 %v247_v28, %v174_v25 }
  0xd4   :  { %v1447_v31 = vpop.f32.mrf.mxu0  ;;  %v1452_v34 = vpop.f32.mrf.mxu1 }
  0xd5   :  { %v322_v32 = vadd.f32 %v321_v30, %v248_v29 }
  0xd6   :  { %v395_v35 = vpop.f32.mrf.mxu0  ;;  %v467_v37 = vpop.f32.mrf.mxu1 }
  0xd7   :  { %v396_v36 = vadd.f32 %v395_v35, %v322_v32 }
  0xd8   :  { %v1457_v38 = vpop.f32.mrf.mxu0  ;;  %v1462_v41 = vpop.f32.mrf.mxu1 }
  0xd9   :  { %v468_v40 = vadd.f32 %v467_v37, %v396_v36 }
  0xdb   :  { %v471_v42 = vmax.f32 %v468_v40, 0.0 }
  0xdd   :  { %v483_v44 = vsel %vm481_vm4, %v471_v42, 0 }
  0xde   :  { %v516_v45 = vand.u32 4294901760, %v483_v44 }
  0xe0   :  { %v593_v46 = vsub.f32 %v483_v44, %v516_v45  ;;  %1464 = vmatpush3.msra.mxu0 %v516_v45 }
  0xe1   :  { %1466 = vmatmul.mubr.f32.vlgmr.msra.gmra.mxu0 %v555_v43  ;;  %1473 = vmatprep.subr.mxu0 %v1535_v0 }
  0xe2   :  { %1474 = vmatpush3.msra.mxu0 %v593_v46  ;;  %1475 = vmatprep.mubr.msk.f32.mxu0 %vm1536_vm2, %v1535_v0  ;;  %v594_v47 = vand.u32 4294901760, %v593_v46 }
  0xe3   :  { %1483 = vmatprep.subr.mxu0 %v1535_v0 }
  0xe4   :  { %v595_v48 = vsub.f32 %v593_v46, %v594_v47 }
  0xe5   :  { %1476 = vmatmul.mubr.f32.vlgmr.msra.gmra.mxu0 %v552_v27 }
  0xe6   :  { %1484 = vmatpush3.msra.mxu0 %v594_v47  ;;  %v596_v49 = vand.u32 4294901760, %v595_v48  ;;  %1485 = vmatprep.mubr.msk.f32.mxu0 %vm1536_vm2, %v1535_v0 }
  0xe7   :  { %1493 = vmatprep.subr.mxu0 %v1535_v0 }
  0xe8   :  { %1469 = vmatpush3.msra.mxu1 %v596_v49 }
  0xe9   :  { %1471 = vmatmul.mubr.f32.vlgmr.msra.gmra.mxu1 %v551_v20  ;;  %1478 = vmatprep.subr.mxu1 %v1535_v0 }
  0xea   :  { %1486 = vmatmul.mubr.f32.vlgmr.msra.gmra.mxu0 %v551_v20  ;;  %1479 = vmatpush3.msra.mxu1 %v516_v45 }
  0xeb   :  { %1480 = vmatprep.mubr.msk.f32.mxu1 %vm1536_vm2, %v1535_v0  ;;  %1488 = vmatprep.subr.mxu1 %v1535_v0 }
  0xec   :  { %1495 = vmatprep.mubr.msk.f32.mxu0 %vm1536_vm2, %v1535_v0 }
  0xed   :  { %1481 = vmatmul.mubr.f32.vlgmr.msra.gmra.mxu1 %v553_v33 }
  0xee   :  { %1489 = vmatpush3.msra.mxu1 %v516_v45  ;;  %1490 = vmatprep.mubr.msk.f32.mxu1 %vm1536_vm2, %v1535_v0 }
  0xef   :  { %1498 = vmatprep.subr.mxu1 %v1535_v0 }
  0xf1   :  { %1491 = vmatmul.mubr.f32.vlgmr.msra.gmra.mxu1 %v551_v20 }
  0xf2   :  { %1500 = vmatprep.mubr.msk.f32.mxu1 %vm1536_vm2, %v1535_v0 }
 0x1a1   :  { %v557_v53 = vpop.f32.mrf.mxu0 }
 0x1a2   :  { %v558_v59 = vadd.f32 %v557_v53, %v474_v51 }
 0x1a3   :  { %v1467_v54 = vpop.f32.mrf.mxu0 }
 0x1a5   :  { %v707_v56 = vpop.f32.mrf.mxu0 }
 0x1a7   :  { %v1477_v58 = vpop.f32.mrf.mxu0 }
 0x1a9   :  { %v633_v60 = vpop.f32.mrf.mxu1 }
 0x1aa   :  { %v634_v61 = vadd.f32 %v633_v60, %v558_v59  ;;  %v855_v62 = vpop.f32.mrf.mxu0 }
 0x1ab   :  { %v1472_v1 = vpop.f32.mrf.mxu1 }
 0x1ac   :  { %v1487_v3 = vpop.f32.mrf.mxu0  ;;  %v708_v4 = vadd.f32 %v707_v56, %v634_v61 }
 0x1ad   :  { %v781_v5 = vpop.f32.mrf.mxu1 }
 0x1ae   :  { %v782_v6 = vadd.f32 %v781_v5, %v708_v4 }
 0x1af   :  { %v1482_v7 = vpop.f32.mrf.mxu1 }
 0x1b0   :  { %v856_v8 = vadd.f32 %v855_v62, %v782_v6 }
 0x1b1   :  { %v927_v9 = vpop.f32.mrf.mxu1 }
 0x1b2   :  { %v928_v11 = vadd.f32 %v927_v9, %v856_v8 }
 0x1b3   :  { %v1492_v12 = vpop.f32.mrf.mxu1 }
 0x1b4   :  { %v931_v13 = vmax.f32 %v928_v11, 0.0 }
 0x1b6   :  { %v941_v15 = vsel %vm481_vm4, %v931_v13, 0 }
 0x1b7   :  { %v974_v16 = vand.u32 4294901760, %v941_v15 }
 0x1b9   :  { %v1051_v17 = vsub.f32 %v941_v15, %v974_v16  ;;  %1494 = vmatpush3.msra.mxu0 %v974_v16 }
 0x1ba   :  { %1496 = vmatmul.mubr.f32.vlgmr.msra.gmra.mxu0 %v1013_v14  ;;  %1503 = vmatprep.subr.mxu0 %v1535_v0 }
 0x1bb   :  { %1504 = vmatpush3.msra.mxu0 %v1051_v17  ;;  %1505 = vmatprep.mubr.msk.f32.mxu0 %vm1536_vm2, %v1535_v0  ;;  %v1052_v18 = vand.u32 4294901760, %v1051_v17 }
 0x1bc   :  { %1513 = vmatprep.subr.mxu0 %v1535_v0 }
 0x1bd   :  { %v1053_v19 = vsub.f32 %v1051_v17, %v1052_v18 }
 0x1be   :  { %1506 = vmatmul.mubr.f32.vlgmr.msra.gmra.mxu0 %v1010_v63 }
 0x1bf   :  { %1514 = vmatpush3.msra.mxu0 %v1052_v18  ;;  %v1054_v20 = vand.u32 4294901760, %v1053_v19  ;;  %1515 = vmatprep.mubr.msk.f32.mxu0 %vm1536_vm2, %v1535_v0 }
 0x1c1   :  { %1499 = vmatpush3.msra.mxu1 %v1054_v20 }
 0x1c2   :  { %1501 = vmatmul.mubr.f32.vlgmr.msra.gmra.mxu1 %v1009_v57  ;;  %1508 = vmatprep.subr.mxu1 %v1535_v0 }
 0x1c3   :  { %1516 = vmatmul.mubr.f32.vlgmr.msra.gmra.mxu0 %v1009_v57  ;;  %1509 = vmatpush3.msra.mxu1 %v974_v16 }
 0x1c4   :  { %1510 = vmatprep.mubr.msk.f32.mxu1 %vm1536_vm2, %v1535_v0  ;;  %1518 = vmatprep.subr.mxu1 %v1535_v0 }
 0x1c6   :  { %1511 = vmatmul.mubr.f32.vlgmr.msra.gmra.mxu1 %v1011_v2 }
 0x1c7   :  { %1519 = vmatpush3.msra.mxu1 %v974_v16  ;;  %1520 = vmatprep.mubr.msk.f32.mxu1 %vm1536_vm2, %v1535_v0 }
 0x1ca   :  { %1521 = vmatmul.mubr.f32.vlgmr.msra.gmra.mxu1 %v1009_v57 }
 0x27a   :  { %v1015_v21 = vpop.f32.mrf.mxu0 }
 0x27b   :  { %v1016_v26 = vadd.f32 %v1015_v21, %v934_v24 }
 0x27c   :  { %v1497_v22 = vpop.f32.mrf.mxu0 }
 0x27e   :  { %v1165_v23 = vpop.f32.mrf.mxu0 }
 0x280   :  { %v1507_v25 = vpop.f32.mrf.mxu0 }
 0x282   :  { %v1091_v27 = vpop.f32.mrf.mxu1 }
 0x283   :  { %v1092_v28 = vadd.f32 %v1091_v27, %v1016_v26  ;;  %v1313_v29 = vpop.f32.mrf.mxu0 }
 0x284   :  { %v1502_v30 = vpop.f32.mrf.mxu1 }
 0x285   :  { %v1517_v31 = vpop.f32.mrf.mxu0  ;;  %v1166_v32 = vadd.f32 %v1165_v23, %v1092_v28 }
 0x286   :  { %v1239_v33 = vpop.f32.mrf.mxu1 }
 0x287   :  { %v1240_v34 = vadd.f32 %v1239_v33, %v1166_v32 }
 0x288   :  { %v1512_v35 = vpop.f32.mrf.mxu1 }
 0x289   :  { %v1314_v36 = vadd.f32 %v1313_v29, %v1240_v34 }
 0x28a   :  { %v1385_v37 = vpop.f32.mrf.mxu1 }
 0x28b   :  { %v1386_v38 = vadd.f32 %v1385_v37, %v1314_v36 }
 0x28c   :  { %v1522_v0 = vpop.f32.mrf.mxu1 }
 0x28d   :  { %1389 = vst [vmem:[%s1637_s2] sm:$0x1] %v1386_v38  ;;  %v1390_v39 = vmul.f32 1.442695, %v1386_v38 }
 0x28f   :  { %1533 = vpow2.f32 %v1390_v39 }
 0x29c   :  { %v1534_v40 = vpop.eup %1533 }
 0x29d   :  { %1392 = vst [vmem:[%s1637_s2] sm:$0x2] %v1534_v40 }

</bundles_post_ra>
